<compile_context>
chip_gen: v6e
topology: v6e:2x2x1
jax: 0.10.0
libtpu: 0.0.40
codegen_flags: <defaults>
</compile_context>

<pallas_src>
import functools

import jax
import jax.numpy as jnp
from jax.experimental import pallas as pl
from jax.experimental.pallas import tpu as pltpu


# ---------------------------------------------------------------------------
# Fused Pallas kernel: whole MLP (+ optional backward mask chain) per batch tile
# ---------------------------------------------------------------------------
def _fused_mlp_kernel(num_layers, get_gradient, *refs):
    """All tensors inside the kernel are laid out (features, batch_tile).

    refs layout:
      x_ref,                                  (in_features, bm)
      w0_ref, b0_ref, ..., w{L-1}, b{L-1},    w: (dout, din), b: (dout, 1)
      [wT_0 ... wT_{L-2}, seed]               backward weights (din, dout) and
                                              seed = W_last^T (hidden, 1)
                                              (only if get_gradient)
      out_ref,                                (out_features, bm)
      [grad_ref]                              (in_features, bm)
    """
    x_ref = refs[0]
    layer_refs = refs[1:1 + 2 * num_layers]
    idx = 1 + 2 * num_layers
    bwd_refs = None
    if get_gradient:
        bwd_refs = refs[idx:idx + num_layers]
        idx += num_layers
    out_ref = refs[idx]
    grad_ref = refs[idx + 1] if get_gradient else None

    bm = x_ref.shape[1]

    # ---- forward: hidden layers (ReLU); activations stay on-chip -----------
    h = x_ref[...]                                   # (in_features, bm)
    acts = []
    for li in range(num_layers - 1):
        w = layer_refs[2 * li][...]                  # (dout, din)
        b = layer_refs[2 * li + 1][...]              # (dout, 1) -> lane broadcast
        z = jnp.dot(w, h, preferred_element_type=jnp.float32) + b
        h = jnp.maximum(z, 0.0)                      # (dout, bm)
        if get_gradient:
            acts.append(h)                           # reused as the ReLU mask

    # ---- final linear (no activation), lane-dense store --------------------
    w_last = layer_refs[2 * (num_layers - 1)][...]       # (out, hidden)
    b_last = layer_refs[2 * (num_layers - 1) + 1][...]   # (out, 1)
    out_ref[...] = (jnp.dot(w_last, h, preferred_element_type=jnp.float32)
                    + b_last).astype(out_ref.dtype)

    # ---- backward mask chain (same math as the PyTorch loop) ---------------
    if get_gradient:
        seed = bwd_refs[num_layers - 1][...]             # (hidden, 1)
        g = jnp.broadcast_to(seed, (seed.shape[0], bm))  # (hidden, bm)
        for li in range(num_layers - 2, -1, -1):
            gm = jnp.where(acts[li] > 0.0, g, 0.0)       # ReLU mask via select
            wT = bwd_refs[li][...]                       # (din, dout)
            g = jnp.dot(wT, gm, preferred_element_type=jnp.float32)  # (din, bm)
        grad_ref[...] = g.astype(grad_ref.dtype)


# ---------------------------------------------------------------------------
# Generation-aware tile selection
# ---------------------------------------------------------------------------
def _vmem_capacity_bytes():
    try:
        return int(pltpu.get_tpu_info().vmem_capacity_bytes)
    except Exception:
        return 64 * 1024 * 1024        # conservative: v7x per-TC VMEM


def _num_tensorcores():
    try:
        d = jax.devices()[0]
        return max(1, int(getattr(d, "num_cores", 1) or 1))
    except Exception:
        return 1


def _pick_bm(B, per_col_bytes, fixed_bytes, vmem_budget, num_cores):
    """Largest lane-aligned batch tile that fits the VMEM budget.

    On single-TC chips (v5e/v6e) the grid is a sequential loop, so the whole
    batch goes in one step whenever it fits; only multi-TC chips (v7x) ask for
    >= num_cores grid steps.
    """
    budget_cols = max(128, int((vmem_budget - fixed_bytes) // max(per_col_bytes, 1)))
    if B <= budget_cols and (num_cores <= 1 or B < 256):
        return B
    cap = (budget_cols // 128) * 128
    if num_cores > 1:
        cap = min(cap, ((B // num_cores) // 128) * 128)
    cap = max(cap, 128)
    for cand in range(cap, 127, -128):
        if B % cand == 0:
            return cand
    return B   # fallback: single full-batch tile


# ---------------------------------------------------------------------------
# Wrapper: one pallas_call per forward
# ---------------------------------------------------------------------------
def relu_model_forward(x, params, get_gradient=False, bm=None):
    """Pallas implementation of ReLU_Model.forward (single fused kernel)."""
    B, in_features = x.shape
    num_layers = len(params)
    out_features = params[-1][0].shape[0]
    widths = [w.shape[0] for w, _ in params]
    hidden = max(widths[:-1]) if num_layers > 1 else out_features

    if get_gradient:
        # Same implicit assumption as the PyTorch module's broadcast.
        assert out_features == 1, "gradient path requires out_features == 1"

    # --- VMEM budgeting (all f32) -------------------------------------------
    param_bytes = 4 * sum(int(w.size) + int(b.size) for w, b in params)
    fixed_bytes = 2 * param_bytes                         # default double-buffering
    if get_gradient:
        fixed_bytes += 2 * param_bytes                    # backward-orientation copies
    per_col = 4 * (2 * in_features + 2 * out_features)    # x/out tiles, dbl-buffered
    if get_gradient:
        per_col += 4 * (2 * in_features + (num_layers - 1) * hidden)
    else:
        per_col += 4 * 2 * hidden                         # transient activations
    vmem_cap = _vmem_capacity_bytes()
    budget = (3 * vmem_cap) // 4

    if bm is None:
        bm = _pick_bm(B, per_col, fixed_bytes, budget, _num_tensorcores())
    assert B % bm == 0 and (bm == B or bm % 128 == 0)

    # --- build pallas_call arguments (batch on the lane axis) ----------------
    x_t = jnp.transpose(x)                                # (in_features, B)
    args = [x_t]
    in_specs = [pl.BlockSpec((in_features, bm), lambda i: (0, i))]
    for w, b in params:
        dout, din = w.shape
        args.append(w)                                    # (dout, din)
        in_specs.append(pl.BlockSpec((dout, din), lambda i: (0, 0)))
        args.append(b)                                    # (dout, 1)
        in_specs.append(pl.BlockSpec((dout, 1), lambda i: (0, 0)))
    if get_gradient:
        for w, _ in params[:-1]:
            wT = jnp.transpose(w)                         # (din, dout)
            args.append(wT)
            in_specs.append(pl.BlockSpec(wT.shape, lambda i: (0, 0)))
        seed = jnp.transpose(params[-1][0])               # (hidden, out == 1)
        args.append(seed)
        in_specs.append(pl.BlockSpec(seed.shape, lambda i: (0, 0)))

    # Lane-dense outputs: (out_features, B) and (in_features, B).
    out_shape = [jax.ShapeDtypeStruct((out_features, B), jnp.float32)]
    out_specs = [pl.BlockSpec((out_features, bm), lambda i: (0, i))]
    if get_gradient:
        out_shape.append(jax.ShapeDtypeStruct((in_features, B), jnp.float32))
        out_specs.append(pl.BlockSpec((in_features, bm), lambda i: (0, i)))

    # --- advisory cost estimate for the XLA scheduler ------------------------
    flops = 2 * B * sum(int(w.shape[0]) * int(w.shape[1]) for w, _ in params)
    if get_gradient:
        flops += 2 * B * sum(int(w.shape[0]) * int(w.shape[1]) for w, _ in params[:-1])
        flops += B * sum(int(w.shape[0]) for w, _ in params[:-1])
    bytes_accessed = 4 * (int(x.size) + out_features * B) + param_bytes
    if get_gradient:
        bytes_accessed += 4 * in_features * B + param_bytes
    cost = pl.CostEstimate(flops=int(flops), transcendentals=0,
                           bytes_accessed=int(bytes_accessed))

    cp_kwargs = dict(dimension_semantics=("parallel",))
    est_vmem = fixed_bytes + per_col * bm
    if est_vmem > 24 * 1024 * 1024:                       # above v5e's 16 MiB default
        cp_kwargs["vmem_limit_bytes"] = int(
            min(vmem_cap - 4 * 1024 * 1024,
                max(32 * 1024 * 1024, 2 * est_vmem)))

    kernel = functools.partial(_fused_mlp_kernel, num_layers, get_gradient)
    outs = pl.pallas_call(
        kernel,
        out_shape=tuple(out_shape),
        grid=(B // bm,),
        in_specs=in_specs,
        out_specs=tuple(out_specs),
        compiler_params=pltpu.CompilerParams(**cp_kwargs),
        cost_estimate=cost,
    )(*args)

    # TODO(synk): x.clone().detach().requires_grad_(True) has no JAX analogue;
    # the input is returned unchanged (gradient is produced explicitly above).
    if get_gradient:
        result_t, grad_t = outs
        return jnp.transpose(result_t), x, jnp.transpose(grad_t)
    (result_t,) = outs
    return jnp.transpose(result_t), x


# ---------------------------------------------------------------------------
# Parameter init (PyTorch-style uniform bounds); weights in (dout, din) layout
# ---------------------------------------------------------------------------
def init_relu_model_params(key, in_features, hidden_features, hidden_layers,
                           out_features):
    dims = [in_features] + [hidden_features] * (hidden_layers + 1) + [out_features]
    params = []
    for i in range(len(dims) - 1):
        din, dout = dims[i], dims[i + 1]
        key, kw, kb = jax.random.split(key, 3)
        bound = 1.0 / (float(din) ** 0.5)
        w = jax.random.uniform(kw, (dout, din), jnp.float32, -bound, bound)
        b = jax.random.uniform(kb, (dout, 1), jnp.float32, -bound, bound)
        params.append((w, b))
    return params


# ---------------------------------------------------------------------------
# Pure-JAX reference for verification (row-major, PyTorch math)
# ---------------------------------------------------------------------------
def ref_forward(x, params, get_gradient=False):
    masks = []
    h = x
    for w, b in params[:-1]:
        h = jnp.maximum(h @ w.T + b.T, 0.0)
        masks.append((h > 0.0).astype(jnp.float32))
    w_last, b_last = params[-1]
    result = h @ w_last.T + b_last.T
    if not get_gradient:
        return result, x
    B = x.shape[0]
    grad = jnp.tile(w_last, (B, 1))                      # (B, hidden), out == 1
    for i in range(len(params) - 2, -1, -1):
        grad = (grad * masks[i]) @ params[i][0]
    return result, x, grad


# ---------------------------------------------------------------------------
if __name__ == "__main__":
    # Small implicit-representation-style config: 2D coords -> 1 scalar.
    in_features, hidden_features, hidden_layers, out_features = 2, 32, 2, 1
    B = 256

    key = jax.random.PRNGKey(0)
    key, kx = jax.random.split(key)
    x = jax.random.normal(kx, (B, in_features), jnp.float32)

    params = init_relu_model_params(key, in_features, hidden_features,
                                    hidden_layers, out_features)

    # Default path: (result, x)
    result, x_out = relu_model_forward(x, params, get_gradient=False)
    jax.block_until_ready(result)

    # Gradient path: (result, x, gradient)
    result_g, _, grad = relu_model_forward(x, params, get_gradient=True)
    jax.block_until_ready(grad)

    # Verify against pure-JAX reference.
    r_ref, _ = ref_forward(x, params, get_gradient=False)
    rg_ref, _, g_ref = ref_forward(x, params, get_gradient=True)
    assert result.shape == (B, out_features)
    assert grad.shape == (B, in_features)
    assert jnp.allclose(result, r_ref, atol=1e-5, rtol=1e-5)
    assert jnp.allclose(result_g, rg_ref, atol=1e-5, rtol=1e-5)
    assert jnp.allclose(grad, g_ref, atol=1e-5, rtol=1e-5)
    assert jnp.allclose(x_out, x)

    print("KERNEL_OK")
</pallas_src>

<mosaic_0001>
module attributes {stable_mosaic.version = 11 : i64} {
  func.func @_fused_mlp_kernel(%arg0: i32, %arg1: memref<2x256xf32, #tpu.memory_space<vmem>>, %arg2: memref<32x2xf32, #tpu.memory_space<vmem>>, %arg3: memref<32x1xf32, #tpu.memory_space<vmem>>, %arg4: memref<32x32xf32, #tpu.memory_space<vmem>>, %arg5: memref<32x1xf32, #tpu.memory_space<vmem>>, %arg6: memref<32x32xf32, #tpu.memory_space<vmem>>, %arg7: memref<32x1xf32, #tpu.memory_space<vmem>>, %arg8: memref<1x32xf32, #tpu.memory_space<vmem>>, %arg9: memref<1x1xf32, #tpu.memory_space<vmem>>, %arg10: memref<1x256xf32, #tpu.memory_space<vmem>>) attributes {dimension_semantics = [#tpu.dimension_semantics<parallel>], iteration_bounds = array<i64: 1>, scalar_prefetch = 0 : i64, scratch_operands = 0 : i64, tpu.core_type = #tpu.core_type<tc>, window_params = [{transform_indices = @transform_0, window_bounds = array<i64: 2, 256>}, {pipeline_mode = #tpu.pipeline_mode<synchronous>, transform_indices = @transform_1, window_bounds = array<i64: 32, 2>}, {pipeline_mode = #tpu.pipeline_mode<synchronous>, transform_indices = @transform_2, window_bounds = array<i64: 32, 1>}, {pipeline_mode = #tpu.pipeline_mode<synchronous>, transform_indices = @transform_3, window_bounds = array<i64: 32, 32>}, {pipeline_mode = #tpu.pipeline_mode<synchronous>, transform_indices = @transform_4, window_bounds = array<i64: 32, 1>}, {pipeline_mode = #tpu.pipeline_mode<synchronous>, transform_indices = @transform_5, window_bounds = array<i64: 32, 32>}, {pipeline_mode = #tpu.pipeline_mode<synchronous>, transform_indices = @transform_6, window_bounds = array<i64: 32, 1>}, {pipeline_mode = #tpu.pipeline_mode<synchronous>, transform_indices = @transform_7, window_bounds = array<i64: 1, 32>}, {pipeline_mode = #tpu.pipeline_mode<synchronous>, transform_indices = @transform_8, window_bounds = array<i64: 1, 1>}, {transform_indices = @transform_9, window_bounds = array<i64: 1, 256>}]} {
    %c0 = arith.constant 0 : index
    %c0_0 = arith.constant 0 : index
    %0 = vector.load %arg1[%c0, %c0_0] : memref<2x256xf32, #tpu.memory_space<vmem>>, vector<2x256xf32>
    %c0_1 = arith.constant 0 : index
    %c0_2 = arith.constant 0 : index
    %1 = vector.load %arg2[%c0_1, %c0_2] : memref<32x2xf32, #tpu.memory_space<vmem>>, vector<32x2xf32>
    %c0_3 = arith.constant 0 : index
    %c0_4 = arith.constant 0 : index
    %2 = vector.load %arg3[%c0_3, %c0_4] : memref<32x1xf32, #tpu.memory_space<vmem>>, vector<32x1xf32>
    %cst = arith.constant dense<0.000000e+00> : vector<32x256xf32>
    %3 = tpu.matmul %1, %0, %cst {dimension_numbers = #tpu.dot_dimension_numbers<[1], [0], [0], [1], [0, 0, 1, 1], [], []>} : vector<32x2xf32>, vector<2x256xf32>, vector<32x256xf32> -> vector<32x256xf32>
    %4 = vector.broadcast %2 : vector<32x1xf32> to vector<32x256xf32>
    %5 = arith.addf %3, %4 : vector<32x256xf32>
    %cst_5 = arith.constant 0.000000e+00 : f32
    %6 = vector.broadcast %cst_5 : f32 to vector<32x256xf32>
    %7 = arith.maximumf %5, %6 : vector<32x256xf32>
    %c0_6 = arith.constant 0 : index
    %c0_7 = arith.constant 0 : index
    %8 = vector.load %arg4[%c0_6, %c0_7] : memref<32x32xf32, #tpu.memory_space<vmem>>, vector<32x32xf32>
    %c0_8 = arith.constant 0 : index
    %c0_9 = arith.constant 0 : index
    %9 = vector.load %arg5[%c0_8, %c0_9] : memref<32x1xf32, #tpu.memory_space<vmem>>, vector<32x1xf32>
    %cst_10 = arith.constant dense<0.000000e+00> : vector<32x256xf32>
    %10 = tpu.matmul %8, %7, %cst_10 {dimension_numbers = #tpu.dot_dimension_numbers<[1], [0], [0], [1], [0, 0, 1, 1], [], []>} : vector<32x32xf32>, vector<32x256xf32>, vector<32x256xf32> -> vector<32x256xf32>
    %11 = vector.broadcast %9 : vector<32x1xf32> to vector<32x256xf32>
    %12 = arith.addf %10, %11 : vector<32x256xf32>
    %cst_11 = arith.constant 0.000000e+00 : f32
    %13 = vector.broadcast %cst_11 : f32 to vector<32x256xf32>
    %14 = arith.maximumf %12, %13 : vector<32x256xf32>
    %c0_12 = arith.constant 0 : index
    %c0_13 = arith.constant 0 : index
    %15 = vector.load %arg6[%c0_12, %c0_13] : memref<32x32xf32, #tpu.memory_space<vmem>>, vector<32x32xf32>
    %c0_14 = arith.constant 0 : index
    %c0_15 = arith.constant 0 : index
    %16 = vector.load %arg7[%c0_14, %c0_15] : memref<32x1xf32, #tpu.memory_space<vmem>>, vector<32x1xf32>
    %cst_16 = arith.constant dense<0.000000e+00> : vector<32x256xf32>
    %17 = tpu.matmul %15, %14, %cst_16 {dimension_numbers = #tpu.dot_dimension_numbers<[1], [0], [0], [1], [0, 0, 1, 1], [], []>} : vector<32x32xf32>, vector<32x256xf32>, vector<32x256xf32> -> vector<32x256xf32>
    %18 = vector.broadcast %16 : vector<32x1xf32> to vector<32x256xf32>
    %19 = arith.addf %17, %18 : vector<32x256xf32>
    %cst_17 = arith.constant 0.000000e+00 : f32
    %20 = vector.broadcast %cst_17 : f32 to vector<32x256xf32>
    %21 = arith.maximumf %19, %20 : vector<32x256xf32>
    %c0_18 = arith.constant 0 : index
    %c0_19 = arith.constant 0 : index
    %22 = vector.load %arg8[%c0_18, %c0_19] : memref<1x32xf32, #tpu.memory_space<vmem>>, vector<1x32xf32>
    %c0_20 = arith.constant 0 : index
    %c0_21 = arith.constant 0 : index
    %23 = vector.load %arg9[%c0_20, %c0_21] : memref<1x1xf32, #tpu.memory_space<vmem>>, vector<1x1xf32>
    %cst_22 = arith.constant dense<0.000000e+00> : vector<1x256xf32>
    %24 = tpu.matmul %22, %21, %cst_22 {dimension_numbers = #tpu.dot_dimension_numbers<[1], [0], [0], [1], [0, 0, 1, 1], [], []>} : vector<1x32xf32>, vector<32x256xf32>, vector<1x256xf32> -> vector<1x256xf32>
    %25 = vector.broadcast %23 : vector<1x1xf32> to vector<1x256xf32>
    %26 = arith.addf %24, %25 : vector<1x256xf32>
    %c0_23 = arith.constant 0 : index
    %c0_24 = arith.constant 0 : index
    %27 = vector.load %arg10[%c0_23, %c0_24] : memref<1x256xf32, #tpu.memory_space<vmem>>, vector<1x256xf32>
    tpu.vector_store %arg10[%c0_23, %c0_24], %26 {strides = array<i32>} : memref<1x256xf32, #tpu.memory_space<vmem>>, vector<1x256xf32>,
    return
  }
  func.func @transform_0(%arg0: i32) -> (i32, i32) {
    %c0_i32 = arith.constant 0 : i32
    %c0_i32_0 = arith.constant 0 : i32
    return %c0_i32, %arg0 : i32, i32
  }
  func.func @transform_1(%arg0: i32) -> (i32, i32) {
    %c0_i32 = arith.constant 0 : i32
    %c0_i32_0 = arith.constant 0 : i32
    %c0_i32_1 = arith.constant 0 : i32
    return %c0_i32, %c0_i32_0 : i32, i32
  }
  func.func @transform_2(%arg0: i32) -> (i32, i32) {
    %c0_i32 = arith.constant 0 : i32
    %c0_i32_0 = arith.constant 0 : i32
    %c0_i32_1 = arith.constant 0 : i32
    return %c0_i32, %c0_i32_0 : i32, i32
  }
  func.func @transform_3(%arg0: i32) -> (i32, i32) {
    %c0_i32 = arith.constant 0 : i32
    %c0_i32_0 = arith.constant 0 : i32
    %c0_i32_1 = arith.constant 0 : i32
    return %c0_i32, %c0_i32_0 : i32, i32
  }
  func.func @transform_4(%arg0: i32) -> (i32, i32) {
    %c0_i32 = arith.constant 0 : i32
    %c0_i32_0 = arith.constant 0 : i32
    %c0_i32_1 = arith.constant 0 : i32
    return %c0_i32, %c0_i32_0 : i32, i32
  }
  func.func @transform_5(%arg0: i32) -> (i32, i32) {
    %c0_i32 = arith.constant 0 : i32
    %c0_i32_0 = arith.constant 0 : i32
    %c0_i32_1 = arith.constant 0 : i32
    return %c0_i32, %c0_i32_0 : i32, i32
  }
  func.func @transform_6(%arg0: i32) -> (i32, i32) {
    %c0_i32 = arith.constant 0 : i32
    %c0_i32_0 = arith.constant 0 : i32
    %c0_i32_1 = arith.constant 0 : i32
    return %c0_i32, %c0_i32_0 : i32, i32
  }
  func.func @transform_7(%arg0: i32) -> (i32, i32) {
    %c0_i32 = arith.constant 0 : i32
    %c0_i32_0 = arith.constant 0 : i32
    %c0_i32_1 = arith.constant 0 : i32
    return %c0_i32, %c0_i32_0 : i32, i32
  }
  func.func @transform_8(%arg0: i32) -> (i32, i32) {
    %c0_i32 = arith.constant 0 : i32
    %c0_i32_0 = arith.constant 0 : i32
    %c0_i32_1 = arith.constant 0 : i32
    return %c0_i32, %c0_i32_0 : i32, i32
  }
  func.func @transform_9(%arg0: i32) -> (i32, i32) {
    %c0_i32 = arith.constant 0 : i32
    %c0_i32_0 = arith.constant 0 : i32
    return %c0_i32, %arg0 : i32, i32
  }
}

</mosaic_0001>

<bundles_post_ra>
// kernel: tpu_custom_call.1
= control target key start
LH: loop header
LB: loop body
LE: loop exit
PB: predicated region body
PF: predicated region fallthrough
CT: control target
= control target key end

     0   :  { %s795_s0 = inlined_call_operand.vmem [shape: f32[2,256], index: 0, kind: input, shape index: {}]   ;;  %s796_s1 = inlined_call_operand.vmem [shape: f32[32,2], index: 1, kind: input, shape index: {}]   ;;  %s797_s2 = inlined_call_operand.vmem [shape: f32[32,1], index: 2, kind: input, shape index: {}]   ;;  %s798_s3 = inlined_call_operand.vmem [shape: f32[32,32], index: 3, kind: input, shape index: {}]   ;;  %s799_s4 = inlined_call_operand.vmem [shape: f32[32,1], index: 4, kind: input, shape index: {}]   ;;  %s800_s5 = inlined_call_operand.vmem [shape: f32[32,32], index: 5, kind: input, shape index: {}]   ;;  %s801_s6 = inlined_call_operand.vmem [shape: f32[32,1], index: 6, kind: input, shape index: {}]   ;;  %s802_s7 = inlined_call_operand.vmem [shape: f32[1,32], index: 7, kind: input, shape index: {}]   ;;  %s803_s8 = inlined_call_operand.<no memory space> [shape: f32[1,1], index: 8, kind: input, shape index: {}]   ;;  %s804_s9 = inlined_call_operand.hbm [shape: f32[1,256], index: 9, kind: output, shape index: {}]  }
   0x1   :  { %v14_v0 = vstv %s803_s8 }
   0x2   :  { %15 = vst [vmem:[#allocation2] sm:$0x1] %v14_v0 }
   0x3   :  { %v585_v1 = vld.sshfl [vmem:[%s795_s0] sm:$0x33 pattern:$0x76325410]  ;;  %vm86_vm0 = vcmask 1041408   ;;  %v631_v3 = vmov 0.0  }
   0x4   :  { %v72_v2 = vcombine.high %v585_v1, %v585_v1  ;;  %167 = vmatprep.mubr.f32.mxu1 %v631_v3  ;;  %155 = vmatprep.mubr.f32.mxu0 %v631_v3  ;;  %v38_v4 = vld [vmem:[%s796_s1 + $0x10] sm:$0xff]  ;;  %vm73_vm1 = vcmask 15360   ;;  %v36_v5 = vld [vmem:[%s796_s1] sm:$0xff]  ;;  %v632_v6 = vmov 0   ;;  %v43_v7 = vld [vmem:[%s797_s2 + $0x18] sm:$0xff] }
   0x5   :  { %607 = vset.pattern.permute.xlu0 %v632_v6  ;;  %608 = vset.pattern.permute.xlu1 %v632_v6  ;;  %v41_v8 = vld [vmem:[%s797_s2 + $0x8] sm:$0xff]  ;;  %v39_v9 = vld [vmem:[%s796_s1 + $0x18] sm:$0xff] }
   0x6   :  { %601 = vmatprep.subr.msk.mxu1 %vm86_vm0, %v72_v2  ;;  %586 = vmatprep.subr.msk.mxu0 %vm86_vm0, %v72_v2  ;;  %v37_v10 = vld [vmem:[%s796_s1 + $0x8] sm:$0xff] }
   0x7   :  { %602 = vmatpush1.msk.msra.mxu1 %vm86_vm0, %v585_v1  ;;  %587 = vmatpush1.msk.msra.mxu0 %vm86_vm0, %v585_v1 }
   0x8   :  { %590 = vmatmul.mubr.msk.f32.vlgmr.msra.gmra.mxu1 %vm73_vm1, %v38_v4  ;;  %588 = vmatmul.mubr.msk.f32.vlgmr.msra.gmra.mxu0 %vm73_vm1, %v36_v5 }
   0x9   :  { %173 = vmatprep.mubr.f32.mxu1 %v631_v3  ;;  %161 = vmatprep.mubr.f32.mxu0 %v631_v3 }
   0xa   :  { %16 = vsyncpa [#allocation4], 0  ;;  %61 = vperm.xlu0 %607, %v43_v7   ;;  %51 = vperm.xlu1 %608, %v41_v8   ;;  %v42_v11 = vld [vmem:[%s797_s2 + $0x10] sm:$0xff]  ;;  %v40_v12 = vld [vmem:[%s797_s2] sm:$0xff]  ;;  %vm216_vm2 = vcmask 261120   ;;  %s634_s30 = smov [#allocation3]  }
   0xb   :  { %v195_v13 = vld [vmem:[%s799_s4 + $0x18] sm:$0xff]  ;;  %v194_v14 = vld [vmem:[%s799_s4 + $0x10] sm:$0xff]  ;;  %v193_v15 = vld [vmem:[%s799_s4 + $0x8] sm:$0xff] }
   0xc   :  { %591 = vmatmul.mubr.msk.f32.gmra.mxu1 %vm73_vm1, %v39_v9  ;;  %589 = vmatmul.mubr.msk.f32.gmra.mxu0 %vm73_vm1, %v37_v10  ;;  %v192_v16 = vld [vmem:[%s799_s4] sm:$0xff]  ;;  %v333_v17 = vld [vmem:[%s801_s6 + $0x18] sm:$0xff]  ;;  %v332_v18 = vld [vmem:[%s801_s6 + $0x10] sm:$0xff] }
   0xd   :  { %293 = vmatprep.mubr.f32.mxu1 %v631_v3  ;;  %430 = vmatprep.mubr.f32.mxu0 %v631_v3  ;;  %v331_v19 = vld [vmem:[%s801_s6 + $0x8] sm:$0xff]  ;;  %v330_v20 = vld [vmem:[%s801_s6] sm:$0xff]  ;;  %v190_v52 = vld [vmem:[%s798_s3 + $0x10] sm:$0xff] }
   0xe   :  { %56 = vperm.xlu0 %607, %v42_v11   ;;  %46 = vperm.xlu1 %608, %v40_v12   ;;  %v464_v21 = vld [vmem:[#allocation2] sm:$0x1]  ;;  %v189_v51 = vld [vmem:[%s798_s3 + $0x8] sm:$0xff]  ;;  %v191_v53 = vld [vmem:[%s798_s3 + $0x18] sm:$0xff] }
   0xf   :  { %v188_v50 = vld [vmem:[%s798_s3] sm:$0xff] }
  0x12   :  { %213 = vperm.xlu0 %607, %v195_v13   ;;  %208 = vperm.xlu1 %608, %v194_v14  }
  0x16   :  { %203 = vperm.xlu0 %607, %v193_v15   ;;  %198 = vperm.xlu1 %608, %v192_v16  }
  0x1a   :  { %351 = vperm.xlu0 %607, %v333_v17   ;;  %346 = vperm.xlu1 %608, %v332_v18  }
  0x1e   :  { %341 = vperm.xlu0 %607, %v331_v19   ;;  %336 = vperm.xlu1 %608, %v330_v20   ;;  %v326_v19 = vld [vmem:[%s800_s5] sm:$0xff]  ;;  %v327_v20 = vld [vmem:[%s800_s5 + $0x8] sm:$0xff] }
  0x22   :  { %467 = vperm.xlu0 %607, %v464_v21   ;;  %v328_v21 = vld [vmem:[%s800_s5 + $0x10] sm:$0xff] }
  0x85   :  { %v62_v22 = vpop.permute.xlu0 %61  ;;  %v52_v27 = vpop.permute.xlu1 %51 }
  0x89   :  { %v57_v30 = vpop.permute.xlu0 %56  ;;  %v47_v39 = vpop.permute.xlu1 %46 }
  0x8d   :  { %v214_v59 = vpop.permute.xlu0 %213  ;;  %v209_v61 = vpop.permute.xlu1 %208 }
  0x91   :  { %v204_v4 = vpop.permute.xlu0 %203  ;;  %v199_v8 = vpop.permute.xlu1 %198 }
  0xc8   :  { %v169_v23 = vpop.f32.mrf.mxu1  ;;  %v157_v24 = vpop.f32.mrf.mxu0 }
  0xc9   :  { %v170_v36 = vadd.f32 %v169_v23, %v57_v30  ;;  %v158_v45 = vadd.f32 %v157_v24, %v47_v39 }
  0xca   :  { %v171_v25 = vpop.f32.mrf.mxu1  ;;  %v159_v26 = vpop.f32.mrf.mxu0 }
  0xcb   :  { %v172_v34 = vadd.f32 %v171_v25, %v57_v30  ;;  %v160_v43 = vadd.f32 %v159_v26, %v47_v39  ;;  %v184_v44 = vmax.f32 %v170_v36, 0.0  ;;  %v180_v49 = vmax.f32 %v158_v45, 0.0  ;;  %v347_v30 = vpop.permute.xlu1 %346 }
  0xcc   :  { %v175_v28 = vpop.f32.mrf.mxu1  ;;  %v163_v29 = vpop.f32.mrf.mxu0 }
  0xcd   :  { %v176_v31 = vadd.f32 %v175_v28, %v62_v22  ;;  %v164_v41 = vadd.f32 %v163_v29, %v52_v27  ;;  %v185_v42 = vmax.f32 %v172_v34, 0.0  ;;  %v181_v48 = vmax.f32 %v160_v43, 0.0  ;;  %v352_v28 = vpop.permute.xlu0 %351 }
  0xce   :  { %v177_v32 = vpop.f32.mrf.mxu1  ;;  %v165_v33 = vpop.f32.mrf.mxu0 }
  0xcf   :  { %v178_v35 = vadd.f32 %v177_v32, %v62_v22  ;;  %v166_v38 = vadd.f32 %v165_v33, %v52_v27  ;;  %v186_v40 = vmax.f32 %v176_v31, 0.0  ;;  %v182_v47 = vmax.f32 %v164_v41, 0.0  ;;  %v329_v22 = vld [vmem:[%s800_s5 + $0x18] sm:$0xff]  ;;  %v337_v39 = vpop.permute.xlu1 %336 }
  0xd1   :  { %v187_v37 = vmax.f32 %v178_v35, 0.0  ;;  %v183_v46 = vmax.f32 %v166_v38, 0.0 }
  0xd3   :  { %253 = vmatprep.subr.mxu1 %v187_v37 }
  0xd4   :  { %254 = vmatpush1.msra.mxu1 %v186_v40 }
  0xd5   :  { %255 = vmatprep.subr.mxu1 %v185_v42 }
  0xd6   :  { %256 = vmatpush1.msra.mxu1 %v184_v44 }
  0xd7   :  { %257 = vmatprep.subr.mxu1 %v183_v46 }
  0xd8   :  { %258 = vmatpush1.msra.mxu1 %v182_v47 }
  0xd9   :  { %259 = vmatprep.subr.mxu1 %v181_v48 }
  0xda   :  { %260 = vmatpush1.msra.mxu1 %v180_v49 }
  0xdb   :  { %592 = vmatmul.mubr.msk.f32.vlgmr.msra.gmra.mxu1 %vm216_vm2, %v188_v50  ;;  %v463_v50 = vld [vmem:[%s802_s7] sm:$0x1]  ;;  %s577_s7 = sshll.u32 %s634_s30, 4  ;;  %s578_s7 = int_to_ptr.vmem [resolvable:$true] %s577_s7 }
  0xdc   :  { %299 = vmatprep.mubr.f32.mxu1 %v631_v3  ;;  %s609_s10 = scalar_lea.vmem %s578_s7, 32  ;;  %p614_p1 = scmp.lt.s32.totalorder %s578_s7, %s578_s7 }
  0xdd   :  { %p610_p0 = scmp.ne.s32.totalorder %s578_s7, %s609_s10  ;;  %p615_p2 = scmp.lt.s32.totalorder %s609_s10, %s609_s10 }
  0xdf   :  { %593 = vmatmul.mubr.msk.f32.gmra.mxu1 %vm216_vm2, %v189_v51  ;;  %v470_v51 = vlaneseq  ;;  %p616_p3 = por %p615_p2, %p614_p1 }
  0xe0   :  { %305 = vmatprep.mubr.f32.mxu1 %v631_v3 }
  0xe1   :  { %vm568_vm3 = vcmp.lt.s32.totalorder %v470_v51, 256  ;;  %p617_p4 = pnand %p616_p3, %p610_p0 }
  0xe3   :  { %594 = vmatmul.mubr.msk.f32.gmra.mxu1 %vm216_vm2, %v190_v52  ;;  %v471_v52 = vshrl.u32 %v470_v51, 7 }
  0xe4   :  { %311 = vmatprep.mubr.f32.mxu1 %v631_v3 }
  0xe7   :  { %595 = vmatmul.mubr.msk.f32.gmra.mxu1 %vm216_vm2, %v191_v53  ;;  %v633_v53 = vmov 1966171168  }
  0xe8   :  { %541 = vmatprep.mubr.f32.mxu1 %v631_v3 }
 0x19b   :  { %v295_v54 = vpop.f32.mrf.mxu1 }
 0x19c   :  { %v296_v13 = vadd.f32 %v295_v54, %v199_v8  ;;  %v552_v54 = vunpack.c.l.s4 %v633_v53 }
 0x19d   :  { %v297_v55 = vpop.f32.mrf.mxu1 }
 0x19e   :  { %v298_v11 = vadd.f32 %v297_v55, %v199_v8  ;;  %v318_v18 = vmax.f32 %v296_v13, 0.0  ;;  %v472_v55 = vsub.s32 0, %v471_v52 }
 0x19f   :  { %v301_v56 = vpop.f32.mrf.mxu1 }
 0x1a0   :  { %v302_v9 = vadd.f32 %v301_v56, %v204_v4  ;;  %v319_v17 = vmax.f32 %v298_v11, 0.0 }
 0x1a1   :  { %v303_v57 = vpop.f32.mrf.mxu1 }
 0x1a2   :  { %v304_v6 = vadd.f32 %v303_v57, %v204_v4  ;;  %v320_v16 = vmax.f32 %v302_v9, 0.0  ;;  %v553_v57 = vunpack.c.0.s8 %v552_v54 }
 0x1a3   :  { %v307_v58 = vpop.f32.mrf.mxu1 }
 0x1a4   :  { %v308_v5 = vadd.f32 %v307_v58, %v209_v61  ;;  %v321_v15 = vmax.f32 %v304_v6, 0.0 }
 0x1a5   :  { %v309_v60 = vpop.f32.mrf.mxu1 }
 0x1a6   :  { %v310_v1 = vadd.f32 %v309_v60, %v209_v61  ;;  %v322_v14 = vmax.f32 %v308_v5, 0.0 }
 0x1a7   :  { %v313_v62 = vpop.f32.mrf.mxu1 }
 0x1a8   :  { %v314_v63 = vadd.f32 %v313_v62, %v214_v59  ;;  %v323_v12 = vmax.f32 %v310_v1, 0.0 }
 0x1a9   :  { %v315_v0 = vpop.f32.mrf.mxu1 }
 0x1aa   :  { %v316_v2 = vadd.f32 %v315_v0, %v214_v59  ;;  %v324_v10 = vmax.f32 %v314_v63, 0.0  ;;  %v556_v63 = vsub.s32 %v553_v57, %v471_v52 }
 0x1ac   :  { %v325_v7 = vmax.f32 %v316_v2, 0.0 }
 0x1ae   :  { %390 = vmatprep.subr.mxu0 %v325_v7 }
 0x1af   :  { %391 = vmatpush1.msra.mxu0 %v324_v10 }
 0x1b0   :  { %392 = vmatprep.subr.mxu0 %v323_v12 }
 0x1b1   :  { %393 = vmatpush1.msra.mxu0 %v322_v14 }
 0x1b2   :  { %394 = vmatprep.subr.mxu0 %v321_v15 }
 0x1b3   :  { %395 = vmatpush1.msra.mxu0 %v320_v16 }
 0x1b4   :  { %396 = vmatprep.subr.mxu0 %v319_v17 }
 0x1b5   :  { %397 = vmatpush1.msra.mxu0 %v318_v18 }
 0x1b6   :  { %596 = vmatmul.mubr.msk.f32.vlgmr.msra.gmra.mxu0 %vm216_vm2, %v326_v19 }
 0x1b7   :  { %436 = vmatprep.mubr.f32.mxu0 %v631_v3 }
 0x1ba   :  { %597 = vmatmul.mubr.msk.f32.gmra.mxu0 %vm216_vm2, %v327_v20 }
 0x1bb   :  { %442 = vmatprep.mubr.f32.mxu0 %v631_v3 }
 0x1be   :  { %598 = vmatmul.mubr.msk.f32.gmra.mxu0 %vm216_vm2, %v328_v21 }
 0x1bf   :  { %448 = vmatprep.mubr.f32.mxu0 %v631_v3  ;;  %v342_v3 = vpop.permute.xlu0 %341 }
 0x1c2   :  { %599 = vmatmul.mubr.msk.f32.gmra.mxu0 %vm216_vm2, %v329_v22 }
 0x1c3   :  { %v468_v56 = vpop.permute.xlu0 %467 }
 0x1c4   :  { %v473_v59 = vrot.slane %v468_v56, %v472_v55 }
 0x276   :  { %v432_v23 = vpop.f32.mrf.mxu0 }
 0x277   :  { %v433_v44 = vadd.f32 %v432_v23, %v337_v39 }
 0x278   :  { %v434_v24 = vpop.f32.mrf.mxu0 }
 0x279   :  { %v435_v42 = vadd.f32 %v434_v24, %v337_v39  ;;  %v455_v49 = vmax.f32 %v433_v44, 0.0 }
 0x27a   :  { %v438_v25 = vpop.f32.mrf.mxu0 }
 0x27b   :  { %v439_v40 = vadd.f32 %v438_v25, %v342_v3  ;;  %v456_v48 = vmax.f32 %v435_v42, 0.0 }
 0x27c   :  { %v440_v26 = vpop.f32.mrf.mxu0 }
 0x27d   :  { %v441_v37 = vadd.f32 %v440_v26, %v342_v3  ;;  %v457_v47 = vmax.f32 %v439_v40, 0.0 }
 0x27e   :  { %v444_v27 = vpop.f32.mrf.mxu0 }
 0x27f   :  { %v445_v36 = vadd.f32 %v444_v27, %v347_v30  ;;  %v458_v46 = vmax.f32 %v441_v37, 0.0 }
 0x280   :  { %v446_v29 = vpop.f32.mrf.mxu0 }
 0x281   :  { %v447_v34 = vadd.f32 %v446_v29, %v347_v30  ;;  %v459_v45 = vmax.f32 %v445_v36, 0.0 }
 0x282   :  { %v450_v31 = vpop.f32.mrf.mxu0 }
 0x283   :  { %v451_v32 = vadd.f32 %v450_v31, %v352_v28  ;;  %v460_v43 = vmax.f32 %v447_v34, 0.0 }
 0x284   :  { %v452_v33 = vpop.f32.mrf.mxu0 }
 0x285   :  { %v453_v35 = vadd.f32 %v452_v33, %v352_v28  ;;  %v461_v41 = vmax.f32 %v451_v32, 0.0 }
 0x287   :  { %v462_v38 = vmax.f32 %v453_v35, 0.0 }
 0x289   :  { %501 = vmatprep.subr.mxu1 %v462_v38 }
 0x28a   :  { %502 = vmatpush1.msra.mxu1 %v461_v41 }
 0x28b   :  { %503 = vmatprep.subr.mxu1 %v460_v43 }
 0x28c   :  { %504 = vmatpush1.msra.mxu1 %v459_v45 }
 0x28d   :  { %505 = vmatprep.subr.mxu1 %v458_v46 }
 0x28e   :  { %506 = vmatpush1.msra.mxu1 %v457_v47 }
 0x28f   :  { %507 = vmatprep.subr.mxu1 %v456_v48 }
 0x290   :  { %508 = vmatpush1.msra.mxu1 %v455_v49 }
 0x291   :  { %600 = vmatmul.mubr.msk.f32.vlgmr.msra.gmra.mxu1 %vm216_vm2, %v463_v50 }
 0x351   :  { %v543_v58 = vpop.f32.mrf.mxu1 }
 0x352   :  { %v544_v61 = vadd.f32 %v543_v58, %v473_v59 }
 0x353   :  { %v545_v60 = vpop.f32.mrf.mxu1 }
 0x354   :  { %v546_v62 = vadd.f32 %v545_v60, %v473_v59 }
 0x356   :  { %v550_v0 = vcombine.low %v544_v61, %v546_v62 }
 0x358   :  { %v557_v1 = vrot.slane %v550_v0, %v556_v63 }
 0x35a   :  { %v564_v2 = vrot.slane %v557_v1, %v556_v63 }
 0x35c   :  { %570 = vst.msk [vmem:[#allocation3] sm:$0x3] %vm568_vm3, %v564_v2 }
 0x35d   :  { %620 = shalt.err (!%p617_p4)
}
 0x35e   :  { %580 = dma.vmem_to_hbm [thread:$0]  %s578_s7, 32, %s804_s9, [#allocation4]  }
 0x35f   :  { %629 = dma.done.wait [#allocation4], 32  }
 0x360   :  { %630 = vsyncadd [#allocation4], 4294967264 }
 0x361   :  { %584 = vsyncpa [#allocation4], 1 }

</bundles_post_ra>
